<compile_context>
chip_gen: v5e
topology: v5e:2x2
jax: 0.10.0
libtpu: 0.0.40
codegen_flags: <defaults>
</compile_context>

<pallas_src>
import jax
import jax.numpy as jnp
from jax.experimental import pallas as pl
from jax.experimental.pallas import tpu as pltpu


def _round_up(x: int, m: int) -> int:
    return ((x + m - 1) // m) * m


def mlp_head_kernel(x_ref, w0_ref, b0_ref, w1_ref, b1_ref, w2_ref, b2_ref, o_ref):
    """One batch tile: (Dropout = identity) -> Linear -> ReLU, three times, fully fused."""
    # x arrives f32; cast to the MXU compute dtype (bf16) on the VMEM tile, not in HBM.
    x = x_ref[...].astype(w0_ref.dtype)
    # Layer 0: Linear(in, H0) -> ReLU   (bf16 MXU operands, f32 accumulate / bias / ReLU)
    h = jnp.dot(x, w0_ref[...], preferred_element_type=jnp.float32)
    h = jnp.maximum(h + b0_ref[...], 0.0)
    # Layer 1: Linear(H0, H1) -> ReLU
    h = jnp.dot(h.astype(w1_ref.dtype), w1_ref[...], preferred_element_type=jnp.float32)
    h = jnp.maximum(h + b1_ref[...], 0.0)
    # Layer 2: Linear(H1, output_padded) -> ReLU (reference applies ReLU after the last
    # layer too). Padded output columns have zero weight + zero bias, so they stay 0.
    h = jnp.dot(h.astype(w2_ref.dtype), w2_ref[...], preferred_element_type=jnp.float32)
    o_ref[...] = jnp.maximum(h + b2_ref[...], 0.0).astype(o_ref.dtype)


def init_params(key, in_features, hidden, out_features, *, compute_dtype=jnp.bfloat16):
    """PyTorch-Linear-style init, pre-transposed to (in, out) and zero-padded so every
    hidden / output width is a multiple of 128 lanes.  Weights are stored in the MXU
    compute dtype (bf16); biases stay f32 (added on the f32 accumulator).
    (If the hidden width is a free hyperparameter, prefer a multiple of 256 on v6e/v7x
    for full MXU utilisation; fixed widths just get 128-lane padding.)"""
    h_pad = _round_up(hidden, 128)
    n_pad = _round_up(out_features, 128)
    ks = jax.random.split(key, 6)

    def linear(kw, kb, fan_in, fan_out, fan_in_pad, fan_out_pad):
        bound = 1.0 / float(fan_in) ** 0.5
        w = jax.random.uniform(kw, (fan_out, fan_in), jnp.float32, -bound, bound)  # torch shape
        b = jax.random.uniform(kb, (fan_out,), jnp.float32, -bound, bound)
        w_t = jnp.zeros((fan_in_pad, fan_out_pad), jnp.float32).at[:fan_in, :fan_out].set(w.T)
        b_row = jnp.zeros((1, fan_out_pad), jnp.float32).at[0, :fan_out].set(b)
        return w_t.astype(compute_dtype), b_row

    w0, b0 = linear(ks[0], ks[1], in_features, hidden, in_features, h_pad)
    w1, b1 = linear(ks[2], ks[3], hidden, hidden, h_pad, h_pad)
    w2, b2 = linear(ks[4], ks[5], hidden, out_features, h_pad, n_pad)
    return (w0, b0, w1, b1, w2, b2)


def multilayer_classifier_head(x, params, out_features, *, tile_b=1024):
    # TODO(synk): DataShift.shift implementation is not provided in the reference;
    # treated here as identity (no-op noise shift). Dropout is identity in eval mode.
    w0, b0, w1, b1, w2, b2 = params
    batch = x.shape[0]
    x_flat = x.reshape(batch, -1).astype(jnp.float32)  # stays f32; bf16 cast is in-kernel
    in_features = x_flat.shape[1]
    assert in_features == w0.shape[0], (in_features, w0.shape)

    h0, h1, n_pad = w0.shape[1], w1.shape[1], w2.shape[1]

    # Row tile: 16-aligned, no larger than the (16-padded) batch, and capped at
    # ceil(batch/2) so the grid has >= 2 steps when batch allows -> both v7x TCs busy.
    tile_b = _round_up(max(16, int(tile_b)), 16)
    tile_b = min(tile_b, _round_up(batch, 16))
    tile_b = max(16, min(tile_b, _round_up(pl.cdiv(batch, 2), 16)))
    num_tiles = pl.cdiv(batch, tile_b)
    padded_rows = num_tiles * tile_b  # whole tiles -> every output store is unmasked

    # VMEM budget: 2x x-tile (double-buffered) + single-buffered weights/biases +
    # 2x out-tile + intermediate headroom, clamped against the generation's capacity.
    weight_bytes = (in_features * h0 + h0 * h1 + h1 * n_pad) * w0.dtype.itemsize
    bias_bytes = (h0 + h1 + n_pad) * 4
    xtile_bytes = tile_b * in_features * 4
    otile_bytes = tile_b * n_pad * 2
    interm_bytes = 2 * tile_b * max(h0, h1) * 4
    est_bytes = 2 * xtile_bytes + weight_bytes + bias_bytes + 2 * otile_bytes + interm_bytes
    try:
        vmem_cap = int(pltpu.get_tpu_info().vmem_capacity_bytes)
    except Exception:
        vmem_cap = 64 * 1024 * 1024  # conservative (v7x per-TC) fallback
    vmem_limit = int(min(max(2 * est_bytes + (8 << 20), 32 << 20), int(0.75 * vmem_cap)))

    flops = 2 * padded_rows * (in_features * h0 + h0 * h1 + h1 * n_pad)
    bytes_accessed = (padded_rows * in_features * 4      # x read (f32)
                      + weight_bytes + bias_bytes        # resident params
                      + padded_rows * n_pad * 2)         # bf16 writeback

    const = lambda i: (0, 0)
    resident = pl.Buffered(1)  # constant-index blocks: no second buffer needed
    out = pl.pallas_call(
        mlp_head_kernel,
        grid=(num_tiles,),
        in_specs=[
            pl.BlockSpec((tile_b, in_features), lambda i: (i, 0)),      # x: tiled over batch
            pl.BlockSpec((in_features, h0), const, pipeline_mode=resident),
            pl.BlockSpec((1, h0), const, pipeline_mode=resident),
            pl.BlockSpec((h0, h1), const, pipeline_mode=resident),
            pl.BlockSpec((1, h1), const, pipeline_mode=resident),
            pl.BlockSpec((h1, n_pad), const, pipeline_mode=resident),
            pl.BlockSpec((1, n_pad), const, pipeline_mode=resident),
        ],
        out_specs=pl.BlockSpec((tile_b, n_pad), lambda i: (i, 0)),
        out_shape=jax.ShapeDtypeStruct((padded_rows, n_pad), jnp.bfloat16),
        compiler_params=pltpu.CompilerParams(
            dimension_semantics=("parallel",),
            vmem_limit_bytes=vmem_limit,
        ),
        cost_estimate=pl.CostEstimate(
            flops=int(flops), transcendentals=0, bytes_accessed=int(bytes_accessed)),
    )(x_flat, w0, b0, w1, b1, w2, b2)
    # Slice off row padding and the 126 zero lanes; tiny, so the f32 upcast is free.
    return out[:batch, :out_features].astype(jnp.float32)


def reference_forward(x, params, out_features):
    """Plain-JAX reference mirroring the PyTorch eval-mode forward with the same
    bf16-operand / f32-accumulate numerics as the kernel."""
    w0, b0, w1, b1, w2, b2 = params
    h = x.reshape(x.shape[0], -1).astype(w0.dtype)
    h = jnp.maximum(jnp.dot(h, w0, preferred_element_type=jnp.float32) + b0, 0.0)
    h = jnp.maximum(jnp.dot(h.astype(w1.dtype), w1, preferred_element_type=jnp.float32) + b1, 0.0)
    h = jnp.maximum(jnp.dot(h.astype(w2.dtype), w2, preferred_element_type=jnp.float32) + b2, 0.0)
    return h[:, :out_features]


if __name__ == "__main__":
    key = jax.random.PRNGKey(0)
    k_x, k_p = jax.random.split(key)

    # Small shapes consistent with a BERT-style classifier head input:
    # x: (batch=2, seq=8, hidden=32) -> flattened input features = 256
    batch, seq, hidden_in = 2, 8, 32
    in_features = seq * hidden_in
    hidden = 128          # stands in for neurons=[300, 300, 300] (would be padded to 384)
    out_features = 2

    x = jax.random.normal(k_x, (batch, seq, hidden_in), dtype=jnp.float32)
    params = init_params(k_p, in_features, hidden, out_features)

    y = multilayer_classifier_head(x, params, out_features)
    y = jax.block_until_ready(y)

    y_ref = reference_forward(x, params, out_features)
    assert y.shape == (batch, out_features), y.shape
    # Kernel writes back through bf16 (lane-dense padded output); 1e-2 tolerance covers
    # that quantization plus MXU-vs-XLA accumulation-order differences.
    assert jnp.allclose(y, y_ref, atol=1e-2, rtol=1e-2), "mismatch vs reference"

    print("KERNEL_OK")
</pallas_src>

<mosaic_0001>
module attributes {stable_mosaic.version = 11 : i64} {
  func.func @mlp_head_kernel(%arg0: i32, %arg1: memref<16x256xf32, #tpu.memory_space<vmem>>, %arg2: memref<256x128xbf16, #tpu.memory_space<vmem>>, %arg3: memref<1x128xf32, #tpu.memory_space<vmem>>, %arg4: memref<128x128xbf16, #tpu.memory_space<vmem>>, %arg5: memref<1x128xf32, #tpu.memory_space<vmem>>, %arg6: memref<128x128xbf16, #tpu.memory_space<vmem>>, %arg7: memref<1x128xf32, #tpu.memory_space<vmem>>, %arg8: memref<16x128xbf16, #tpu.memory_space<vmem>>) attributes {dimension_semantics = [#tpu.dimension_semantics<parallel>], iteration_bounds = array<i64: 1>, scalar_prefetch = 0 : i64, scratch_operands = 0 : i64, tpu.core_type = #tpu.core_type<tc>, window_params = [{transform_indices = @transform_0, window_bounds = array<i64: 16, 256>}, {pipeline_mode = #tpu.pipeline_mode<synchronous>, transform_indices = @transform_1, window_bounds = array<i64: 256, 128>}, {pipeline_mode = #tpu.pipeline_mode<synchronous>, transform_indices = @transform_2, window_bounds = array<i64: 1, 128>}, {pipeline_mode = #tpu.pipeline_mode<synchronous>, transform_indices = @transform_3, window_bounds = array<i64: 128, 128>}, {pipeline_mode = #tpu.pipeline_mode<synchronous>, transform_indices = @transform_4, window_bounds = array<i64: 1, 128>}, {pipeline_mode = #tpu.pipeline_mode<synchronous>, transform_indices = @transform_5, window_bounds = array<i64: 128, 128>}, {pipeline_mode = #tpu.pipeline_mode<synchronous>, transform_indices = @transform_6, window_bounds = array<i64: 1, 128>}, {transform_indices = @transform_7, window_bounds = array<i64: 16, 128>}]} {
    %c0 = arith.constant 0 : index
    %c0_0 = arith.constant 0 : index
    %0 = vector.load %arg1[%c0, %c0_0] : memref<16x256xf32, #tpu.memory_space<vmem>>, vector<16x256xf32>
    %1 = arith.truncf %0 : vector<16x256xf32> to vector<16x256xbf16>
    %c0_1 = arith.constant 0 : index
    %c0_2 = arith.constant 0 : index
    %2 = vector.load %arg2[%c0_1, %c0_2] : memref<256x128xbf16, #tpu.memory_space<vmem>>, vector<256x128xbf16>
    %cst = arith.constant dense<0.000000e+00> : vector<16x128xf32>
    %3 = tpu.matmul %1, %2, %cst {dimension_numbers = #tpu.dot_dimension_numbers<[1], [0], [0], [1], [0, 0, 1, 1], [], []>} : vector<16x256xbf16>, vector<256x128xbf16>, vector<16x128xf32> -> vector<16x128xf32>
    %c0_3 = arith.constant 0 : index
    %c0_4 = arith.constant 0 : index
    %4 = vector.load %arg3[%c0_3, %c0_4] : memref<1x128xf32, #tpu.memory_space<vmem>>, vector<1x128xf32>
    %5 = vector.broadcast %4 : vector<1x128xf32> to vector<16x128xf32>
    %6 = arith.addf %3, %5 : vector<16x128xf32>
    %cst_5 = arith.constant 0.000000e+00 : f32
    %7 = vector.broadcast %cst_5 : f32 to vector<16x128xf32>
    %8 = arith.maximumf %6, %7 : vector<16x128xf32>
    %9 = arith.truncf %8 : vector<16x128xf32> to vector<16x128xbf16>
    %c0_6 = arith.constant 0 : index
    %c0_7 = arith.constant 0 : index
    %10 = vector.load %arg4[%c0_6, %c0_7] : memref<128x128xbf16, #tpu.memory_space<vmem>>, vector<128x128xbf16>
    %cst_8 = arith.constant dense<0.000000e+00> : vector<16x128xf32>
    %11 = tpu.matmul %9, %10, %cst_8 {dimension_numbers = #tpu.dot_dimension_numbers<[1], [0], [0], [1], [0, 0, 1, 1], [], []>} : vector<16x128xbf16>, vector<128x128xbf16>, vector<16x128xf32> -> vector<16x128xf32>
    %c0_9 = arith.constant 0 : index
    %c0_10 = arith.constant 0 : index
    %12 = vector.load %arg5[%c0_9, %c0_10] : memref<1x128xf32, #tpu.memory_space<vmem>>, vector<1x128xf32>
    %13 = vector.broadcast %12 : vector<1x128xf32> to vector<16x128xf32>
    %14 = arith.addf %11, %13 : vector<16x128xf32>
    %cst_11 = arith.constant 0.000000e+00 : f32
    %15 = vector.broadcast %cst_11 : f32 to vector<16x128xf32>
    %16 = arith.maximumf %14, %15 : vector<16x128xf32>
    %17 = arith.truncf %16 : vector<16x128xf32> to vector<16x128xbf16>
    %c0_12 = arith.constant 0 : index
    %c0_13 = arith.constant 0 : index
    %18 = vector.load %arg6[%c0_12, %c0_13] : memref<128x128xbf16, #tpu.memory_space<vmem>>, vector<128x128xbf16>
    %cst_14 = arith.constant dense<0.000000e+00> : vector<16x128xf32>
    %19 = tpu.matmul %17, %18, %cst_14 {dimension_numbers = #tpu.dot_dimension_numbers<[1], [0], [0], [1], [0, 0, 1, 1], [], []>} : vector<16x128xbf16>, vector<128x128xbf16>, vector<16x128xf32> -> vector<16x128xf32>
    %c0_15 = arith.constant 0 : index
    %c0_16 = arith.constant 0 : index
    %20 = vector.load %arg7[%c0_15, %c0_16] : memref<1x128xf32, #tpu.memory_space<vmem>>, vector<1x128xf32>
    %21 = vector.broadcast %20 : vector<1x128xf32> to vector<16x128xf32>
    %22 = arith.addf %19, %21 : vector<16x128xf32>
    %cst_17 = arith.constant 0.000000e+00 : f32
    %23 = vector.broadcast %cst_17 : f32 to vector<16x128xf32>
    %24 = arith.maximumf %22, %23 : vector<16x128xf32>
    %25 = arith.truncf %24 : vector<16x128xf32> to vector<16x128xbf16>
    %c0_18 = arith.constant 0 : index
    %c0_19 = arith.constant 0 : index
    %26 = vector.load %arg8[%c0_18, %c0_19] : memref<16x128xbf16, #tpu.memory_space<vmem>>, vector<16x128xbf16>
    tpu.vector_store %arg8[%c0_18, %c0_19], %25 {strides = array<i32>} : memref<16x128xbf16, #tpu.memory_space<vmem>>, vector<16x128xbf16>,
    return
  }
  func.func @transform_0(%arg0: i32) -> (i32, i32) {
    %c0_i32 = arith.constant 0 : i32
    %c0_i32_0 = arith.constant 0 : i32
    return %arg0, %c0_i32 : i32, i32
  }
  func.func @transform_1(%arg0: i32) -> (i32, i32) {
    %c0_i32 = arith.constant 0 : i32
    %c0_i32_0 = arith.constant 0 : i32
    %c0_i32_1 = arith.constant 0 : i32
    return %c0_i32, %c0_i32_0 : i32, i32
  }
  func.func @transform_2(%arg0: i32) -> (i32, i32) {
    %c0_i32 = arith.constant 0 : i32
    %c0_i32_0 = arith.constant 0 : i32
    %c0_i32_1 = arith.constant 0 : i32
    return %c0_i32, %c0_i32_0 : i32, i32
  }
  func.func @transform_3(%arg0: i32) -> (i32, i32) {
    %c0_i32 = arith.constant 0 : i32
    %c0_i32_0 = arith.constant 0 : i32
    %c0_i32_1 = arith.constant 0 : i32
    return %c0_i32, %c0_i32_0 : i32, i32
  }
  func.func @transform_4(%arg0: i32) -> (i32, i32) {
    %c0_i32 = arith.constant 0 : i32
    %c0_i32_0 = arith.constant 0 : i32
    %c0_i32_1 = arith.constant 0 : i32
    return %c0_i32, %c0_i32_0 : i32, i32
  }
  func.func @transform_5(%arg0: i32) -> (i32, i32) {
    %c0_i32 = arith.constant 0 : i32
    %c0_i32_0 = arith.constant 0 : i32
    %c0_i32_1 = arith.constant 0 : i32
    return %c0_i32, %c0_i32_0 : i32, i32
  }
  func.func @transform_6(%arg0: i32) -> (i32, i32) {
    %c0_i32 = arith.constant 0 : i32
    %c0_i32_0 = arith.constant 0 : i32
    %c0_i32_1 = arith.constant 0 : i32
    return %c0_i32, %c0_i32_0 : i32, i32
  }
  func.func @transform_7(%arg0: i32) -> (i32, i32) {
    %c0_i32 = arith.constant 0 : i32
    %c0_i32_0 = arith.constant 0 : i32
    return %arg0, %c0_i32 : i32, i32
  }
}

</mosaic_0001>

<bundles_post_ra>
// kernel: tpu_custom_call.1
= control target key start
LH: loop header
LB: loop body
LE: loop exit
PB: predicated region body
PF: predicated region fallthrough
CT: control target
= control target key end

     0   :  { %12 = vsyncpa [#allocation3], 0  ;;  %s877_s0 = inlined_call_operand.hbm [shape: f32[2,256], index: 0, kind: input, shape index: {}]   ;;  %s878_s1 = inlined_call_operand.hbm [shape: bf16[256,128], index: 1, kind: input, shape index: {}]   ;;  %s879_s2 = inlined_call_operand.vmem [shape: f32[1,128], index: 2, kind: input, shape index: {}]   ;;  %s880_s3 = inlined_call_operand.hbm [shape: bf16[128,128], index: 3, kind: input, shape index: {}]   ;;  %s881_s4 = inlined_call_operand.vmem [shape: f32[1,128], index: 4, kind: input, shape index: {}]   ;;  %s882_s5 = inlined_call_operand.hbm [shape: bf16[128,128], index: 5, kind: input, shape index: {}]   ;;  %s883_s6 = inlined_call_operand.vmem [shape: f32[1,128], index: 6, kind: input, shape index: {}]   ;;  %s884_s7 = inlined_call_operand.hbm [shape: bf16[16,128], index: 7, kind: output, shape index: {}]  }
   0x1   :  { %13 = vsyncpa [#allocation6], 0 }
   0x2   :  { %14 = vsyncpa [#allocation9], 0 }
   0x3   :  { %15 = vsyncpa [#allocation4], 0 }
   0x4   :  { %19 = vsyncadd [#allocation3], 448  ;;  %s33_s26 = sshll.u32 %s878_s1, 4  ;;  %s791_s27 = smov [#allocation5]   ;;  %s34_s26 = int_to_ptr.hbm [resolvable:$true] %s33_s26 }
   0x5   :  { %s35_s28 = sshll.u32 %s791_s27, 4  ;;  %s20_s8 = sshll.u32 %s877_s0, 4  ;;  %s36_s28 = int_to_ptr.vmem [resolvable:$true] %s35_s28  ;;  %s21_s8 = int_to_ptr.hbm [resolvable:$true] %s20_s8 }
   0x6   :  { %s792_s9 = smov 64   ;;  %s793_s10 = smov 4  }
   0x7   :  { %41 = dma.hbm_to_vmem [thread:$0]  %s34_s26, 2048, %s36_s28, [#allocation6], %s792_s9, %s792_s9, %s793_s10  }
   0x8   :  { %s794_s11 = smov [#allocation2]   ;;  %s48_s1 = sshll.u32 %s880_s3, 4  ;;  %s49_s1 = int_to_ptr.hbm [resolvable:$true] %s48_s1 }
   0x9   :  { %s22_s12 = sshll.u32 %s794_s11, 4  ;;  %s63_s16 = sshll.u32 %s882_s5, 4  ;;  %s23_s12 = int_to_ptr.vmem [resolvable:$true] %s22_s12  ;;  %s64_s16 = int_to_ptr.hbm [resolvable:$true] %s63_s16 }
   0xa   :  { %28 = dma.hbm_to_vmem [thread:$0]  %s21_s8, 64, %s23_s12, [#allocation3], %s792_s9, %s792_s9, %s793_s10  }
   0xb   :  { %s795_s17 = smov [#allocation7]   ;;  %s796_s19 = smov [#allocation8]  }
   0xc   :  { %s50_s18 = sshll.u32 %s795_s17, 4  ;;  %s65_s3 = sshll.u32 %s796_s19, 4  ;;  %s51_s18 = int_to_ptr.vmem [resolvable:$true] %s50_s18  ;;  %s66_s3 = int_to_ptr.vmem [resolvable:$true] %s65_s3 }
   0xd   :  { %56 = dma.hbm_to_vmem [thread:$0]  %s49_s1, 1024, %s51_s18, [#allocation6], %s792_s9, %s792_s9, %s793_s10  }
   0xe   :  { %71 = dma.hbm_to_vmem [thread:$0]  %s64_s16, 1024, %s66_s3, [#allocation9], %s792_s9, %s792_s9, %s793_s10  }
   0xf   :  { %783 = dma.done.wait [#allocation3], 512  }
  0x10   :  { %784 = vsyncadd [#allocation3], 4294966784 }
  0x11   :  { %785 = dma.done.wait [#allocation6], 3072  }
  0x12   :  { %786 = vsyncadd [#allocation6], 4294964224 }
  0x13   :  { %787 = dma.done.wait [#allocation9], 1024  }
  0x14   :  { %788 = vsyncadd [#allocation9], 4294966272  ;;  %v623_v0 = vld [vmem:[#allocation5 + $0x38] sm:$0xff]  ;;  %v622_v2 = vld [vmem:[#allocation5 + $0x30] sm:$0xff]  ;;  %s797_s24 = smov [#allocation10]  }
  0x15   :  { %v631_v1 = vld [vmem:[#allocation5 + $0x78] sm:$0xff]  ;;  %263 = vmatpush.bf16.msra.mxu0 %v623_v0  ;;  %v630_v3 = vld [vmem:[#allocation5 + $0x70] sm:$0xff]  ;;  %v90_v4 = vld [vmem:[#allocation2] sm:$0xf]  ;;  %s471_s25 = sshll.u32 %s797_s24, 4  ;;  %s472_s25 = int_to_ptr.vmem [resolvable:$true] %s471_s25 }
  0x16   :  { %277 = vmatpush.bf16.msra.mxu1 %v631_v1  ;;  %v621_v5 = vld [vmem:[#allocation5 + $0x28] sm:$0xff]  ;;  %v91_v7 = vld [vmem:[#allocation2 + $0x4] sm:$0xf]  ;;  %v94_v12 = vld [vmem:[#allocation2 + $0x10] sm:$0xf] }
  0x17   :  { %v629_v6 = vld [vmem:[#allocation5 + $0x68] sm:$0xff]  ;;  %v620_v10 = vld [vmem:[#allocation5 + $0x20] sm:$0xff]  ;;  %106 = vst [vmem:[#allocation1] ss:$4 sm:$0xff] %v90_v4  ;;  %v639_v13 = vld [vmem:[#allocation7 + $0x38] sm:$0xff] }
  0x18   :  { %v92_v8 = vld [vmem:[#allocation2 + $0x8] sm:$0xf]  ;;  %v93_v9 = vld [vmem:[#allocation2 + $0xc] sm:$0xf]  ;;  %v628_v11 = vld [vmem:[#allocation5 + $0x60] sm:$0xff]  ;;  %362 = vmatpush.bf16.msra.mxu2 %v639_v13 }
  0x19   :  { %264 = vmatpush.bf16.msra.mxu0 %v622_v2  ;;  %v95_v14 = vld [vmem:[#allocation2 + $0x14] sm:$0xf]  ;;  %108 = vst [vmem:[#allocation1 + $0x1] ss:$4 sm:$0xff] %v91_v7  ;;  %v96_v15 = vld [vmem:[#allocation2 + $0x18] sm:$0xf] }
  0x1a   :  { %278 = vmatpush.bf16.msra.mxu1 %v630_v3  ;;  %110 = vst [vmem:[#allocation1 + $0x2] ss:$4 sm:$0xff] %v92_v8  ;;  %v638_v16 = vld [vmem:[#allocation7 + $0x30] sm:$0xff]  ;;  %v97_v17 = vld [vmem:[#allocation2 + $0x1c] sm:$0xf]  ;;  %v637_v20 = vld [vmem:[#allocation7 + $0x28] sm:$0xff] }
  0x1b   :  { %112 = vst [vmem:[#allocation1 + $0x3] ss:$4 sm:$0xff] %v93_v9  ;;  %v619_v18 = vld [vmem:[#allocation5 + $0x18] sm:$0xff]  ;;  %v618_v21 = vld [vmem:[#allocation5 + $0x10] sm:$0xff]  ;;  %v636_v23 = vld [vmem:[#allocation7 + $0x20] sm:$0xff] }
  0x1c   :  { %114 = vst [vmem:[#allocation1 + $0x20] ss:$4 sm:$0xff] %v94_v12  ;;  %v627_v19 = vld [vmem:[#allocation5 + $0x58] sm:$0xff]  ;;  %363 = vmatpush.bf16.msra.mxu2 %v638_v16  ;;  %v626_v22 = vld [vmem:[#allocation5 + $0x50] sm:$0xff]  ;;  %v617_v24 = vld [vmem:[#allocation5 + $0x8] sm:$0xff] }
  0x1d   :  { %265 = vmatpush.bf16.msra.mxu0 %v621_v5  ;;  %116 = vst [vmem:[#allocation1 + $0x21] ss:$4 sm:$0xff] %v95_v14  ;;  %v625_v25 = vld [vmem:[#allocation5 + $0x48] sm:$0xff]  ;;  %v616_v26 = vld [vmem:[#allocation5] sm:$0xff]  ;;  %v635_v34 = vld [vmem:[#allocation7 + $0x18] sm:$0xff] }
  0x1e   :  { %279 = vmatpush.bf16.msra.mxu1 %v629_v6  ;;  %118 = vst [vmem:[#allocation1 + $0x22] ss:$4 sm:$0xff] %v96_v15  ;;  %v624_v27 = vld [vmem:[#allocation5 + $0x40] sm:$0xff]  ;;  %v634_v35 = vld [vmem:[#allocation7 + $0x10] sm:$0xff]  ;;  %v633_v36 = vld [vmem:[#allocation7 + $0x8] sm:$0xff] }
  0x1f   :  { %120 = vst [vmem:[#allocation1 + $0x23] ss:$4 sm:$0xff] %v97_v17  ;;  %v632_v37 = vld [vmem:[#allocation7] sm:$0xff]  ;;  %v647_v38 = vld [vmem:[#allocation8 + $0x38] sm:$0xff]  ;;  %v646_v39 = vld [vmem:[#allocation8 + $0x30] sm:$0xff] }
  0x20   :  { %364 = vmatpush.bf16.msra.mxu2 %v637_v20  ;;  %447 = vmatpush.bf16.msra.mxu3 %v647_v38  ;;  %v645_v40 = vld [vmem:[#allocation8 + $0x28] sm:$0xff]  ;;  %v644_v41 = vld [vmem:[#allocation8 + $0x20] sm:$0xff]  ;;  %v660_v44 = vld [vmem:[%s879_s2] ss:$0 sm:$0xff] }
  0x21   :  { %266 = vmatpush.bf16.msra.mxu0 %v620_v10  ;;  %v643_v54 = vld [vmem:[#allocation8 + $0x18] sm:$0xff]  ;;  %v642_v55 = vld [vmem:[#allocation8 + $0x10] sm:$0xff]  ;;  %v641_v56 = vld [vmem:[#allocation8 + $0x8] sm:$0xff] }
  0x22   :  { %280 = vmatpush.bf16.msra.mxu1 %v628_v11  ;;  %v121_v28 = vld.sshfl [vmem:[#allocation1] sm:$0xff pattern:$0x73625140]  ;;  %v122_v29 = vld.sshfl [vmem:[#allocation1 + $0x8] sm:$0xff pattern:$0x73625140] }
  0x23   :  { %v640_v57 = vld [vmem:[#allocation8] sm:$0xff]  ;;  %v661_v59 = vld [vmem:[%s881_s4] ss:$0 sm:$0xff]  ;;  %s473_s4 = sshll.u32 %s884_s7, 4  ;;  %s474_s4 = int_to_ptr.hbm [resolvable:$true] %s473_s4 }
  0x24   :  { %365 = vmatpush.bf16.msra.mxu2 %v636_v23  ;;  %448 = vmatpush.bf16.msra.mxu3 %v646_v39  ;;  %v662_v3 = vld [vmem:[%s883_s6] ss:$0 sm:$0xff] }
  0x25   :  { %267 = vmatpush.bf16.msra.mxu0 %v619_v18 }
  0x26   :  { %281 = vmatpush.bf16.msra.mxu1 %v627_v19  ;;  %v123_v30 = vld.sshfl [vmem:[#allocation1 + $0x20] sm:$0xff pattern:$0x73625140]  ;;  %v124_v31 = vld.sshfl [vmem:[#allocation1 + $0x28] sm:$0xff pattern:$0x73625140] }
  0x27   :  { %v129_v32 = vpack.c.bf16 %v123_v30, %v121_v28  ;;  %v130_v33 = vpack.c.bf16 %v124_v31, %v122_v29 }
  0x28   :  { %366 = vmatpush.bf16.msra.mxu2 %v635_v34  ;;  %449 = vmatpush.bf16.msra.mxu3 %v645_v40 }
  0x29   :  { %268 = vmatpush.bf16.msra.mxu0 %v618_v21 }
  0x2a   :  { %282 = vmatpush.bf16.msra.mxu1 %v626_v22 }
  0x2c   :  { %367 = vmatpush.bf16.msra.mxu2 %v634_v35  ;;  %450 = vmatpush.bf16.msra.mxu3 %v644_v41 }
  0x2d   :  { %269 = vmatpush.bf16.msra.mxu0 %v617_v24 }
  0x2e   :  { %283 = vmatpush.bf16.msra.mxu1 %v625_v25 }
  0x30   :  { %368 = vmatpush.bf16.msra.mxu2 %v633_v36  ;;  %451 = vmatpush.bf16.msra.mxu3 %v643_v54 }
  0x31   :  { %270 = vmatpush.bf16.msra.mxu0 %v616_v26 }
  0x32   :  { %284 = vmatpush.bf16.msra.mxu1 %v624_v27 }
  0x34   :  { %271 = vmatmul.bf16.vlgmr.msra.gmra.mxu0 %v129_v32  ;;  %369 = vmatpush.bf16.msra.mxu2 %v632_v37 }
  0x35   :  { %285 = vmatmul.bf16.vlgmr.msra.gmra.mxu1 %v130_v33  ;;  %452 = vmatpush.bf16.msra.mxu3 %v642_v55 }
  0x39   :  { %453 = vmatpush.bf16.msra.mxu3 %v641_v56 }
  0x3d   :  { %454 = vmatpush.bf16.msra.mxu3 %v640_v57 }
  0xb1   :  { %v272_v42 = vpop.f32.mrf.mxu0 }
  0xb2   :  { %v286_v43 = vpop.f32.mrf.mxu1  ;;  %v273_v45 = vadd.f32 %v660_v44, %v272_v42 }
  0xb4   :  { %v287_v47 = vadd.f32 %v286_v43, %v273_v45 }
  0xb6   :  { %v291_v51 = vmax.f32 %v287_v47, 0.0 }
  0xb9   :  { %v274_v46 = vpop.f32.mrf.mxu0 }
  0xba   :  { %v275_v48 = vadd.f32 %v660_v44, %v274_v46  ;;  %v288_v49 = vpop.f32.mrf.mxu1 }
  0xbc   :  { %v289_v50 = vadd.f32 %v288_v49, %v275_v48 }
  0xbe   :  { %v292_v52 = vmax.f32 %v289_v50, 0.0 }
  0xc0   :  { %v293_v53 = vpack.c.bf16 %v292_v52, %v291_v51 }
  0xc2   :  { %370 = vmatmul.bf16.vlgmr.msra.gmra.mxu2 %v293_v53 }
 0x145   :  { %v371_v58 = vpop.f32.mrf.mxu2 }
 0x146   :  { %v372_v60 = vadd.f32 %v661_v59, %v371_v58 }
 0x148   :  { %v376_v63 = vmax.f32 %v372_v60, 0.0 }
 0x14d   :  { %v373_v61 = vpop.f32.mrf.mxu2 }
 0x14e   :  { %v374_v62 = vadd.f32 %v661_v59, %v373_v61 }
 0x150   :  { %v377_v0 = vmax.f32 %v374_v62, 0.0 }
 0x152   :  { %v378_v1 = vpack.c.bf16 %v377_v0, %v376_v63 }
 0x154   :  { %455 = vmatmul.bf16.vlgmr.msra.gmra.mxu3 %v378_v1 }
 0x1d7   :  { %v456_v2 = vpop.f32.mrf.mxu3 }
 0x1d8   :  { %v457_v4 = vadd.f32 %v662_v3, %v456_v2 }
 0x1da   :  { %v461_v7 = vmax.f32 %v457_v4, 0.0 }
 0x1df   :  { %v458_v5 = vpop.f32.mrf.mxu3 }
 0x1e0   :  { %v459_v6 = vadd.f32 %v662_v3, %v458_v5 }
 0x1e2   :  { %v462_v8 = vmax.f32 %v459_v6, 0.0 }
 0x1e4   :  { %v651_v9 = vpack.c.bf16 %v462_v8, %v461_v7 }
 0x1e6   :  { %652 = vst [vmem:[#allocation10] sm:$0xff] %v651_v9  }
 0x1e7   :  { %479 = dma.vmem_to_hbm [thread:$0]  %s472_s25, 128, %s474_s4, [#allocation4], %s792_s9, %s792_s9, %s793_s10  }
 0x1e8   :  { %789 = dma.done.wait [#allocation4], 128  }
 0x1e9   :  { %790 = vsyncadd [#allocation4], 4294967168 }
 0x1ea   :  { %484 = vsyncpa [#allocation3], 1 }
 0x1eb   :  { %485 = vsyncpa [#allocation6], 1 }
 0x1ec   :  { %486 = vsyncpa [#allocation9], 1 }
 0x1ed   :  { %487 = vsyncpa [#allocation4], 1 }

</bundles_post_ra>
